<compile_context>
chip_gen: v7x
topology: tpu7x:2x2x1
jax: 0.10.0
libtpu: 0.0.40
codegen_flags: <defaults>
</compile_context>

<pallas_src>
import functools
import math

import jax
import jax.numpy as jnp
from jax.experimental import pallas as pl
from jax.experimental.pallas import tpu as pltpu


# ---------------------------------------------------------------------------
# Kernel
# ---------------------------------------------------------------------------
def generator_kernel(x_ref, w_ref, b_ref, probs_ref, idx_ref,
                     m_scr, l_scr, amax_scr):
    vi = pl.program_id(1)
    n_v = pl.num_programs(1)
    tile_v = w_ref.shape[1]

    @pl.when(vi == 0)
    def _init():
        m_scr[...] = jnp.full_like(m_scr, -jnp.inf)
        l_scr[...] = jnp.zeros_like(l_scr)
        amax_scr[...] = jnp.zeros_like(amax_scr)

    # Linear projection on the MXU: bf16 inputs, f32 accumulation,
    # bias added as a single f32 VPU op (kept out of the MXU for numerics).
    logits = jnp.dot(x_ref[...], w_ref[...],
                     preferred_element_type=jnp.float32) + b_ref[...]

    # Stage raw logits into the VMEM-resident (tile_b, vocab) output block.
    col0 = pl.multiple_of(vi * tile_v, tile_v)
    probs_ref[:, pl.ds(col0, tile_v)] = logits

    # Per-tile max + first-hit argmax on raw logits
    # (argmax(logits) == argmax(log_softmax(logits))).
    tile_max = jnp.max(logits, axis=-1, keepdims=True)
    lane_ids = jax.lax.broadcasted_iota(jnp.int32, logits.shape, 1)
    tile_arg = jnp.min(
        jnp.where(logits == tile_max, lane_ids, jnp.int32(tile_v)),
        axis=-1, keepdims=True) + vi * tile_v

    # Online softmax state update.
    m_old = m_scr[...]
    m_new = jnp.maximum(m_old, tile_max)
    l_scr[...] = (l_scr[...] * jnp.exp(m_old - m_new)
                  + jnp.sum(jnp.exp(logits - m_new), axis=-1, keepdims=True))
    # First-hit ties across tiles: only replace on a strict improvement.
    amax_scr[...] = jnp.where(tile_max > m_old, tile_arg,
                              amax_scr[...]).astype(jnp.int32)
    m_scr[...] = m_new

    @pl.when(vi == n_v - 1)
    def _finalize():
        # Serial per-batch-tile epilogue: one full RMW of the resident block.
        # Kept in-kernel so the module returns true log-probs (spec parity).
        lse = m_scr[...] + jnp.log(l_scr[...])
        probs_ref[...] = probs_ref[...] - lse       # logits -> log_softmax
        idx_ref[...] = amax_scr[...]


# ---------------------------------------------------------------------------
# Generation-aware sizing helpers
# ---------------------------------------------------------------------------
def _hw_info():
    """(vmem_capacity_bytes, mxu_rows) with conservative fallbacks."""
    vmem_cap = 64 * 1024 * 1024                 # conservative (v7x) fallback
    try:
        vmem_cap = int(pltpu.get_tpu_info().vmem_capacity_bytes)
    except Exception:
        pass
    mxu_rows = 256                              # v6e/v7x: 2x256x256 MXU
    try:
        kind = jax.devices()[0].device_kind.lower()
        if "v5" in kind or "v4" in kind:        # 128-wide MXU generations
            mxu_rows = 128
    except Exception:
        pass
    return vmem_cap, mxu_rows


def _select_tile_b(B, vocab, vmem_cap, mxu_rows):
    """Largest batch tile that (a) divides B, (b) keeps the resident
    (tile_b, vocab) f32 output block (counted double-buffered) inside ~40%
    of VMEM, and (c) stops at the point of diminishing returns:
    256 on 256-wide-MXU parts (full LHS), 128 on v5e (already MXU-matched).
    Larger tile_b also means the weight stream is re-read fewer times."""
    probs_budget = int(vmem_cap * 0.40)
    fit_cap = max(8, probs_budget // (2 * vocab * 4))
    target = 256 if mxu_rows >= 256 else 128
    cap = min(fit_cap, target)
    if B <= cap:
        return B
    # Largest multiple-of-8 divisor of B that fits (sublane alignment).
    for t in range(cap - (cap % 8), 7, -8):
        if B % t == 0:
            return t
    # Pathological B: fall back to the whole batch (full-dim block is legal).
    return B


def _select_tile_v(vocab, d_model, vmem_cap):
    """Largest multiple-of-128 divisor of vocab whose double-buffered bf16
    (d_model, tile_v) weight tile fits ~30% of VMEM (d_model-aware)."""
    weight_budget = int(vmem_cap * 0.30)
    max_v = max(128, weight_budget // (2 * 2 * d_model))   # 2 bufs, bf16
    max_v = min(max_v, vocab, 8192)                        # diminishing returns
    best = 0
    tv = 128
    while tv <= max_v:
        if vocab % tv == 0:
            best = tv
        tv += 128
    if best == 0:
        # No lane-aligned divisor within budget: use the full vocab block
        # (full array dim is always a legal block dim).
        best = vocab
    return best


# ---------------------------------------------------------------------------
# Host wrapper
# ---------------------------------------------------------------------------
@functools.partial(jax.jit, static_argnames=("tile_v", "tile_b"))
def generator_forward(x, w_t, b, *, tile_v=None, tile_b=None):
    """x: [B, d_model], w_t: [d_model, vocab] (pre-transposed), b: [1, vocab] f32.

    Returns (log_probs [B, vocab] f32, argmax ids [B, 1] int32)."""
    B, d_model = x.shape
    vocab = w_t.shape[1]

    vmem_cap, mxu_rows = _hw_info()

    if tile_b is None:
        tile_b = _select_tile_b(B, vocab, vmem_cap, mxu_rows)
    assert B % tile_b == 0, (B, tile_b)
    if tile_v is None:
        tile_v = _select_tile_v(vocab, d_model, vmem_cap)
    assert vocab % tile_v == 0, (vocab, tile_v)

    n_b = B // tile_b
    n_v = vocab // tile_v

    # Stream in bf16 (halves HBM bytes on the weight-bound path).
    x_bf = x.astype(jnp.bfloat16)
    w_bf = w_t.astype(jnp.bfloat16)
    b_f32 = b.astype(jnp.float32)

    # VMEM accounting (everything counted at 2 buffers) + per-tile temporaries.
    temp_bytes = 4 * tile_b * tile_v * 4            # logits/exp/iota/select
    vmem_bytes = (2 * d_model * tile_v * 2          # bf16 weight tiles
                  + 2 * tile_v * 4                  # f32 bias tiles
                  + 2 * tile_b * d_model * 2        # bf16 x tiles
                  + 2 * tile_b * vocab * 4          # resident probs block
                  + 2 * tile_b * 4                  # idx block
                  + 3 * max(tile_b, 8) * 128 * 4    # scratch (lane-padded)
                  + temp_bytes)
    # Generation-aware scoped-VMEM request: never below what we account for,
    # never above ~92% of physical (≈118 MiB on v5e/v6e, ≈59 MiB on v7x).
    vmem_limit = int(min(max(vmem_bytes + (4 << 20), 16 << 20),
                         int(vmem_cap * 0.92)))

    # Advisory cost: weights/bias are re-streamed once per batch tile (n_b).
    cost = pl.CostEstimate(
        flops=2 * B * d_model * vocab,
        transcendentals=B * vocab,
        bytes_accessed=(x_bf.size * 2
                        + n_b * w_bf.size * 2
                        + n_b * b_f32.size * 4
                        + B * vocab * 4              # f32 log-prob writeback
                        + B * 4),
    )

    probs, idx = pl.pallas_call(
        generator_kernel,
        out_shape=(
            jax.ShapeDtypeStruct((B, vocab), jnp.float32),
            jax.ShapeDtypeStruct((B, 1), jnp.int32),
        ),
        grid_spec=pltpu.PrefetchScalarGridSpec(
            num_scalar_prefetch=0,
            grid=(n_b, n_v),
            in_specs=[
                pl.BlockSpec((tile_b, d_model), lambda bi, vi: (bi, 0)),
                pl.BlockSpec((d_model, tile_v), lambda bi, vi: (0, vi)),
                pl.BlockSpec((1, tile_v), lambda bi, vi: (0, vi)),
            ],
            out_specs=[
                # Output block is resident across the vocab axis (accumulator);
                # written back to HBM once per batch tile, lane-dense.
                pl.BlockSpec((tile_b, vocab), lambda bi, vi: (bi, 0)),
                pl.BlockSpec((tile_b, 1), lambda bi, vi: (bi, 0)),
            ],
            scratch_shapes=[
                pltpu.VMEM((tile_b, 1), jnp.float32),   # running max
                pltpu.VMEM((tile_b, 1), jnp.float32),   # running sum-exp
                pltpu.VMEM((tile_b, 1), jnp.int32),     # running argmax
            ],
        ),
        compiler_params=pltpu.CompilerParams(
            # batch axis megacore-parallel; vocab axis carries the reduction.
            dimension_semantics=("parallel", "arbitrary"),
            vmem_limit_bytes=vmem_limit),
        cost_estimate=cost,
    )(x_bf, w_bf, b_f32)
    return probs, idx


# TODO(synk): self.sp.id_to_piece is a SentencePiece lookup (host-side string
# table) with no Pallas equivalent; we emulate it with a synthetic id->string map.
def ids_to_words(idx):
    return [f"<piece_{int(i)}>" for i in idx.reshape(-1)]


class GeneratorPallas:
    def __init__(self, d_model, vocab, key, tile_v=None, tile_b=None):
        kw, kb = jax.random.split(key)
        # nn.Linear(d_model, vocab): weight [vocab, d_model], bias [vocab].
        bound = 1.0 / (d_model ** 0.5)
        w = jax.random.uniform(kw, (vocab, d_model), jnp.float32, -bound, bound)
        self.w_t = jnp.transpose(w).astype(jnp.bfloat16)   # [d_model, vocab] bf16
        self.b = jax.random.uniform(kb, (1, vocab), jnp.float32, -bound, bound)
        self.tile_v = tile_v
        self.tile_b = tile_b

    def __call__(self, x):
        probs, idx = generator_forward(x, self.w_t, self.b,
                                       tile_v=self.tile_v, tile_b=self.tile_b)
        words = ids_to_words(jax.device_get(idx))
        return probs, words


if __name__ == "__main__":
    key = jax.random.PRNGKey(0)
    k_x, k_p = jax.random.split(key)

    B, d_model, vocab = 8, 64, 1024
    x = jax.random.normal(k_x, (B, d_model), jnp.float32)

    # tile_v=256 -> 4 vocab tiles: exercises the online softmax/argmax path.
    gen = GeneratorPallas(d_model, vocab, k_p, tile_v=256)
    probs, words = gen(x)
    probs = jax.block_until_ready(probs)

    # Sanity check against a plain-JAX reference (same bf16-cast inputs).
    x_ref = x.astype(jnp.bfloat16).astype(jnp.float32)
    w_ref = gen.w_t.astype(jnp.float32)
    logits_ref = x_ref @ w_ref + gen.b
    probs_ref = jax.nn.log_softmax(logits_ref, axis=-1)
    assert jnp.allclose(probs, probs_ref, atol=1e-4, rtol=1e-4)

    # argmax / words consistency (first-hit semantics, deterministic vs own probs).
    idx_check = jnp.argmax(probs, axis=-1)
    assert words == [f"<piece_{int(i)}>" for i in idx_check]
    assert jnp.array_equal(idx_check, jnp.argmax(probs_ref, axis=-1))

    # Also exercise the auto-sized (tile_v=None, tile_b=None) path.
    probs_auto, _ = generator_forward(x, gen.w_t, gen.b)
    probs_auto = jax.block_until_ready(probs_auto)
    assert jnp.allclose(probs_auto, probs_ref, atol=1e-4, rtol=1e-4)

    print("KERNEL_OK")
</pallas_src>

<mosaic_0001>
module attributes {stable_mosaic.version = 11 : i64} {
  func.func @generator_kernel(%arg0: i32, %arg1: i32, %arg2: memref<8x64xbf16, #tpu.memory_space<vmem>>, %arg3: memref<64x256xbf16, #tpu.memory_space<vmem>>, %arg4: memref<1x256xf32, #tpu.memory_space<vmem>>, %arg5: memref<8x1024xf32, #tpu.memory_space<vmem>>, %arg6: memref<8x1xi32, #tpu.memory_space<vmem>>, %arg7: memref<8x1xf32, #tpu.memory_space<vmem>>, %arg8: memref<8x1xf32, #tpu.memory_space<vmem>>, %arg9: memref<8x1xi32, #tpu.memory_space<vmem>>) attributes {dimension_semantics = [#tpu.dimension_semantics<parallel>, #tpu.dimension_semantics<arbitrary>], iteration_bounds = array<i64: 1, 4>, scalar_prefetch = 0 : i64, scratch_operands = 3 : i64, tpu.core_type = #tpu.core_type<tc>, window_params = [{transform_indices = @transform_0, window_bounds = array<i64: 8, 64>}, {transform_indices = @transform_1, window_bounds = array<i64: 64, 256>}, {transform_indices = @transform_2, window_bounds = array<i64: 1, 256>}, {transform_indices = @transform_3, window_bounds = array<i64: 8, 1024>}, {transform_indices = @transform_4, window_bounds = array<i64: 8, 1>}]} {
    %c0_i32 = arith.constant 0 : i32
    %0 = arith.cmpi eq, %arg1, %c0_i32 : i32
    %1 = arith.extui %0 : i1 to i32
    %c0_i32_0 = arith.constant 0 : i32
    %2 = arith.cmpi ne, %1, %c0_i32_0 : i32
    scf.if %2 {
      %cst_25 = arith.constant 0xFF800000 : f32
      %46 = vector.broadcast %cst_25 : f32 to vector<8x1xf32>
      %c0_26 = arith.constant 0 : index
      %c0_27 = arith.constant 0 : index
      %47 = vector.load %arg7[%c0_26, %c0_27] : memref<8x1xf32, #tpu.memory_space<vmem>>, vector<8x1xf32>
      tpu.vector_store %arg7[%c0_26, %c0_27], %46 {strides = array<i32>} : memref<8x1xf32, #tpu.memory_space<vmem>>, vector<8x1xf32>,
      %cst_28 = arith.constant 0.000000e+00 : f32
      %48 = vector.broadcast %cst_28 : f32 to vector<8x1xf32>
      %c0_29 = arith.constant 0 : index
      %c0_30 = arith.constant 0 : index
      %49 = vector.load %arg8[%c0_29, %c0_30] : memref<8x1xf32, #tpu.memory_space<vmem>>, vector<8x1xf32>
      tpu.vector_store %arg8[%c0_29, %c0_30], %48 {strides = array<i32>} : memref<8x1xf32, #tpu.memory_space<vmem>>, vector<8x1xf32>,
      %c0_i32_31 = arith.constant 0 : i32
      %50 = vector.broadcast %c0_i32_31 : i32 to vector<8x1xi32>
      %c0_32 = arith.constant 0 : index
      %c0_33 = arith.constant 0 : index
      %51 = vector.load %arg9[%c0_32, %c0_33] : memref<8x1xi32, #tpu.memory_space<vmem>>, vector<8x1xi32>
      tpu.vector_store %arg9[%c0_32, %c0_33], %50 {strides = array<i32>} : memref<8x1xi32, #tpu.memory_space<vmem>>, vector<8x1xi32>,
    } else {
    }
    %c0 = arith.constant 0 : index
    %c0_1 = arith.constant 0 : index
    %3 = vector.load %arg2[%c0, %c0_1] : memref<8x64xbf16, #tpu.memory_space<vmem>>, vector<8x64xbf16>
    %c0_2 = arith.constant 0 : index
    %c0_3 = arith.constant 0 : index
    %4 = vector.load %arg3[%c0_2, %c0_3] : memref<64x256xbf16, #tpu.memory_space<vmem>>, vector<64x256xbf16>
    %cst = arith.constant dense<0.000000e+00> : vector<8x256xf32>
    %5 = tpu.matmul %3, %4, %cst {dimension_numbers = #tpu.dot_dimension_numbers<[1], [0], [0], [1], [0, 0, 1, 1], [], []>} : vector<8x64xbf16>, vector<64x256xbf16>, vector<8x256xf32> -> vector<8x256xf32>
    %c0_4 = arith.constant 0 : index
    %c0_5 = arith.constant 0 : index
    %6 = vector.load %arg4[%c0_4, %c0_5] : memref<1x256xf32, #tpu.memory_space<vmem>>, vector<1x256xf32>
    %7 = vector.broadcast %6 : vector<1x256xf32> to vector<8x256xf32>
    %8 = arith.addf %5, %7 : vector<8x256xf32>
    %c256_i32 = arith.constant 256 : i32
    %9 = arith.muli %arg1, %c256_i32 : i32
    %10 = tpu.assume_multiple %9, 256 : i32
    %c0_6 = arith.constant 0 : index
    %11 = arith.index_cast %10 : i32 to index
    %12 = vector.load %arg5[%c0_6, %11] : memref<8x1024xf32, #tpu.memory_space<vmem>>, vector<8x256xf32>
    tpu.vector_store %arg5[%c0_6, %11], %8 {strides = array<i32>} : memref<8x1024xf32, #tpu.memory_space<vmem>>, vector<8x256xf32>,
    %cst_7 = arith.constant dense<0xFF800000> : vector<8xf32>
    %13 = vector.multi_reduction <maximumf>, %8, %cst_7 [1] : vector<8x256xf32> to vector<8xf32>
    %14 = vector.shape_cast %13 : vector<8xf32> to vector<8x1xf32>
    %15 = tpu.iota {dimensions = array<i32: 1>} : vector<8x256xi32>
    %16 = vector.broadcast %14 : vector<8x1xf32> to vector<8x256xf32>
    %17 = arith.cmpf oeq, %8, %16 : vector<8x256xf32>
    %c256_i32_8 = arith.constant 256 : i32
    %18 = vector.broadcast %c256_i32_8 : i32 to vector<8x256xi32>
    %19 = arith.select %17, %15, %18 : vector<8x256xi1>, vector<8x256xi32>
    %cst_9 = arith.constant dense<2147483647> : vector<8xi32>
    %20 = vector.multi_reduction <minsi>, %19, %cst_9 [1] : vector<8x256xi32> to vector<8xi32>
    %21 = vector.shape_cast %20 : vector<8xi32> to vector<8x1xi32>
    %c256_i32_10 = arith.constant 256 : i32
    %22 = arith.muli %arg1, %c256_i32_10 : i32
    %23 = vector.broadcast %22 : i32 to vector<8x1xi32>
    %24 = arith.addi %21, %23 : vector<8x1xi32>
    %c0_11 = arith.constant 0 : index
    %c0_12 = arith.constant 0 : index
    %25 = vector.load %arg7[%c0_11, %c0_12] : memref<8x1xf32, #tpu.memory_space<vmem>>, vector<8x1xf32>
    %26 = arith.maximumf %25, %14 : vector<8x1xf32>
    %c0_13 = arith.constant 0 : index
    %c0_14 = arith.constant 0 : index
    %27 = vector.load %arg8[%c0_13, %c0_14] : memref<8x1xf32, #tpu.memory_space<vmem>>, vector<8x1xf32>
    %28 = arith.subf %25, %26 : vector<8x1xf32>
    %29 = math.exp %28 : vector<8x1xf32>
    %30 = arith.mulf %27, %29 : vector<8x1xf32>
    %31 = vector.broadcast %26 : vector<8x1xf32> to vector<8x256xf32>
    %32 = arith.subf %8, %31 : vector<8x256xf32>
    %33 = math.exp %32 : vector<8x256xf32>
    %cst_15 = arith.constant dense<0.000000e+00> : vector<8xf32>
    %34 = vector.multi_reduction <add>, %33, %cst_15 [1] : vector<8x256xf32> to vector<8xf32>
    %35 = vector.shape_cast %34 : vector<8xf32> to vector<8x1xf32>
    %36 = arith.addf %30, %35 : vector<8x1xf32>
    %c0_16 = arith.constant 0 : index
    %c0_17 = arith.constant 0 : index
    %37 = vector.load %arg8[%c0_16, %c0_17] : memref<8x1xf32, #tpu.memory_space<vmem>>, vector<8x1xf32>
    tpu.vector_store %arg8[%c0_16, %c0_17], %36 {strides = array<i32>} : memref<8x1xf32, #tpu.memory_space<vmem>>, vector<8x1xf32>,
    %38 = arith.cmpf ogt, %14, %25 : vector<8x1xf32>
    %c0_18 = arith.constant 0 : index
    %c0_19 = arith.constant 0 : index
    %39 = vector.load %arg9[%c0_18, %c0_19] : memref<8x1xi32, #tpu.memory_space<vmem>>, vector<8x1xi32>
    %40 = arith.select %38, %24, %39 : vector<8x1xi1>, vector<8x1xi32>
    %c0_20 = arith.constant 0 : index
    %c0_21 = arith.constant 0 : index
    %41 = vector.load %arg9[%c0_20, %c0_21] : memref<8x1xi32, #tpu.memory_space<vmem>>, vector<8x1xi32>
    tpu.vector_store %arg9[%c0_20, %c0_21], %40 {strides = array<i32>} : memref<8x1xi32, #tpu.memory_space<vmem>>, vector<8x1xi32>,
    %c0_22 = arith.constant 0 : index
    %c0_23 = arith.constant 0 : index
    %42 = vector.load %arg7[%c0_22, %c0_23] : memref<8x1xf32, #tpu.memory_space<vmem>>, vector<8x1xf32>
    tpu.vector_store %arg7[%c0_22, %c0_23], %26 {strides = array<i32>} : memref<8x1xf32, #tpu.memory_space<vmem>>, vector<8x1xf32>,
    %c3_i32 = arith.constant 3 : i32
    %43 = arith.cmpi eq, %arg1, %c3_i32 : i32
    %44 = arith.extui %43 : i1 to i32
    %c0_i32_24 = arith.constant 0 : i32
    %45 = arith.cmpi ne, %44, %c0_i32_24 : i32
    scf.if %45 {
      %c0_25 = arith.constant 0 : index
      %c0_26 = arith.constant 0 : index
      %46 = vector.load %arg7[%c0_25, %c0_26] : memref<8x1xf32, #tpu.memory_space<vmem>>, vector<8x1xf32>
      %c0_27 = arith.constant 0 : index
      %c0_28 = arith.constant 0 : index
      %47 = vector.load %arg8[%c0_27, %c0_28] : memref<8x1xf32, #tpu.memory_space<vmem>>, vector<8x1xf32>
      %48 = math.log %47 : vector<8x1xf32>
      %49 = arith.addf %46, %48 : vector<8x1xf32>
      %c0_29 = arith.constant 0 : index
      %c0_30 = arith.constant 0 : index
      %50 = vector.load %arg5[%c0_29, %c0_30] : memref<8x1024xf32, #tpu.memory_space<vmem>>, vector<8x1024xf32>
      %51 = vector.broadcast %49 : vector<8x1xf32> to vector<8x1024xf32>
      %52 = arith.subf %50, %51 : vector<8x1024xf32>
      %c0_31 = arith.constant 0 : index
      %c0_32 = arith.constant 0 : index
      %53 = vector.load %arg5[%c0_31, %c0_32] : memref<8x1024xf32, #tpu.memory_space<vmem>>, vector<8x1024xf32>
      tpu.vector_store %arg5[%c0_31, %c0_32], %52 {strides = array<i32>} : memref<8x1024xf32, #tpu.memory_space<vmem>>, vector<8x1024xf32>,
      %c0_33 = arith.constant 0 : index
      %c0_34 = arith.constant 0 : index
      %54 = vector.load %arg9[%c0_33, %c0_34] : memref<8x1xi32, #tpu.memory_space<vmem>>, vector<8x1xi32>
      %c0_35 = arith.constant 0 : index
      %c0_36 = arith.constant 0 : index
      %55 = vector.load %arg6[%c0_35, %c0_36] : memref<8x1xi32, #tpu.memory_space<vmem>>, vector<8x1xi32>
      tpu.vector_store %arg6[%c0_35, %c0_36], %54 {strides = array<i32>} : memref<8x1xi32, #tpu.memory_space<vmem>>, vector<8x1xi32>,
    } else {
    }
    return
  }
  func.func @transform_0(%arg0: i32, %arg1: i32) -> (i32, i32) {
    %c0_i32 = arith.constant 0 : i32
    %c0_i32_0 = arith.constant 0 : i32
    return %arg0, %c0_i32 : i32, i32
  }
  func.func @transform_1(%arg0: i32, %arg1: i32) -> (i32, i32) {
    %c0_i32 = arith.constant 0 : i32
    %c0_i32_0 = arith.constant 0 : i32
    return %c0_i32, %arg1 : i32, i32
  }
  func.func @transform_2(%arg0: i32, %arg1: i32) -> (i32, i32) {
    %c0_i32 = arith.constant 0 : i32
    %c0_i32_0 = arith.constant 0 : i32
    return %c0_i32, %arg1 : i32, i32
  }
  func.func @transform_3(%arg0: i32, %arg1: i32) -> (i32, i32) {
    %c0_i32 = arith.constant 0 : i32
    %c0_i32_0 = arith.constant 0 : i32
    return %arg0, %c0_i32 : i32, i32
  }
  func.func @transform_4(%arg0: i32, %arg1: i32) -> (i32, i32) {
    %c0_i32 = arith.constant 0 : i32
    %c0_i32_0 = arith.constant 0 : i32
    return %arg0, %c0_i32 : i32, i32
  }
}

</mosaic_0001>

<bundles_post_ra>
// kernel: generator_forward.1
= control target key start
LH: loop header
LB: loop body
LE: loop exit
PB: predicated region body
PF: predicated region fallthrough
CT: control target
= control target key end

     0   :  { %10 = vsyncpa [#allocation6], 0  ;;  %s1071_s0 = inlined_call_operand.vmem [shape: bf16[8,64], index: 0, kind: input, shape index: {}]   ;;  %s1072_s1 = inlined_call_operand.hbm [shape: bf16[64,1024], index: 1, kind: input, shape index: {}]   ;;  %s1073_s2 = inlined_call_operand.vmem [shape: f32[1,1024], index: 2, kind: input, shape index: {}]   ;;  %s1074_s3 = inlined_call_operand.hbm [shape: f32[8,1024], index: 3, kind: output, shape index: {0}]   ;;  %s1075_s4 = inlined_call_operand.vmem [shape: s32[8,1], index: 4, kind: output, shape index: {1}]  }
   0x1   :  { %12 = vsyncpa [#allocation6 + $0x1], 0 }
   0x2   :  { %13 = vsyncpa [#allocation7], 0  ;;  %s881_s15 = smov 0   ;;  %s883_s16 = smov 0  }
   0x3   :  { %s885_s17 = smov 0   ;;  %s887_s18 = smov 0  }
   0x4   :  { %s889_s19 = smov 0   ;;  %s891_s20 = smov 0  }
   0x5 LB: > { %s613_s21 = sadd.s32 4294967295, %s844_s20   ;;  %s28_s22 = sadd.s32 1, %s840_s19  ;;  %s844_s20 = sphi %s891_s20, %s19_s20   ;;  %s840_s19 = sphi %s889_s19, %s1085_s19   ;;  %s836_s18 = sphi %s887_s18, %s1084_s18   ;;  %s832_s17 = sphi %s885_s17, %s1083_s17   ;;  %s828_s16 = sphi %s883_s16, %s1082_s16   ;;  %s824_s15 = sphi %s881_s15, %s1081_s15  }
   0x6   : > { %p29_p0 = scmp.ge.s32.totalorder %s28_s22, 4  ;;  %s64_s23 = sadd.s32 1, %s832_s17 }
   0x7   : > { %p71_p1 = scmp.ne.s32.totalorder %s832_s17, %s828_s16  ;;  %p72_p2 = scmp.eq.s32.totalorder %s844_s20, 0 }
   0x8   : > { %s1087_s22 = smov (%p29_p0, %s28_s22), 0  ;;  %p77_p4 = scmp.ne.s32.totalorder %s828_s16, %s824_s15 }
   0x9   : > { %p917_p3 = por %p72_p2, %p71_p1  ;;  %s61_s25 = ssub.s32 %s840_s19, %s1087_s22 }
   0xa   : > { %p78_p5 = scmp.eq.s32.totalorder %s613_s21, 0  ;;  %p62_p6 = scmp.eq.s32.totalorder %s61_s25, 0 }
   0xb   : > { %p652_p8 = scmp.lt.s32.totalorder %s844_s20, 4  ;;  %s186_s28 = sand.u32 1, %s832_s17  }
   0xc   : > { %p926_p7 = por %p78_p5, %p77_p4  ;;  %s641_s29 = sshll.u32 %s840_s19, 7 }
   0xd   : > { %s932_s27 = scalar_select %p62_p6, %s832_s17, %s64_s23  }
   0xe   : > { %s617_s30 = sshll.u32 %s186_s28, 6  ;;  %s939_s7 = scalar_lea.hbm %s1072_s1, %s641_s29 }
   0xf   : > { %s190_s8 = scalar_lea.vmem [#allocation5], %s617_s30  ;;  %p943_p9 = pnand %p652_p8, %p917_p3 }
  0x10   : > { %s197_s9 = sshll.u32 %s190_s8, 4  ;;  %s950_s11 = scalar_lea.sflag [#allocation6], %s186_s28  ;;  %s947_s9 = int_to_ptr.vmem [resolvable:$true] %s197_s9 }
  0x11   : > { %s734_s12 = scalar_lea.hbm %s939_s7, 1024  ;;  %p736_p12 = pneg %p943_p9 }
  0x12   : > { %p735_p11 = scmp.ne.s32.totalorder %s939_s7, %s734_s12  ;;  %s739_s15 = scalar_lea.hbm %s1072_s1, 4096 }
  0x13   : > { %p740_p1 = scmp.lt.u32.totalorder %s939_s7, %s1072_s1  ;;  %p741_p2 = scmp.lt.u32.totalorder %s739_s15, %s734_s12 }
  0x14   : > { %p737_p13 = pnand %p736_p12, %p735_p11  ;;  %p743_p4 = scmp.lt.u32.totalorder %s734_s12, %s939_s7 }
  0x15   : > { %p742_p3 = por %p741_p2, %p740_p1 }
  0x16   : > { %p738_p0 = pneg %p737_p13 }
  0x17   : > { %p744_p5 = por %p743_p4, %p742_p3 }
  0x19   : > { %p745_p6 = pnand %p744_p5, %p738_p0 }
  0x1b   : > { %748 = shalt.err (!%p745_p6)
}
  0x1c   : > { %s749_s25 = scalar_lea.vmem %s947_s9, 1024  ;;  %s846_s28 = smov [#allocation5]  }
  0x1d   : > { %p750_p8 = scmp.ne.s32.totalorder %s947_s9, %s749_s25  ;;  %s754_s29 = sshll.u32 %s846_s28, 4  ;;  %s755_s29 = int_to_ptr.vmem [resolvable:$false] %s754_s29 }
  0x1e   : > { %s756_s30 = scalar_lea.vmem %s755_s29, 2048  ;;  %p757_p10 = scmp.lt.s32.totalorder %s947_s9, %s755_s29 }
  0x1f   : > { %p752_p11 = pnand %p750_p8, %p736_p12  ;;  %p758_p1 = scmp.lt.s32.totalorder %s756_s30, %s749_s25 }
  0x21   : > { %p753_p13 = pneg %p752_p11  ;;  %p759_p2 = por %p758_p1, %p757_p10 }
  0x23   : > { %p760_p3 = pnand %p759_p2, %p753_p13 }
  0x25   : > { %763 = shalt.err (!%p760_p3)
}
  0x26   : > { %s847_s5 = smov 512   ;;  %s848_s6 = smov 128  }
  0x27   : > { %s849_s8 = smov 8   ;;  %p213_p12 = scmp.lt.s32.totalorder %s844_s20, 5 }
  0x28   : > { %651 = dma.hbm_to_vmem [thread:$0]  (!%p943_p9), %s939_s7, 1024, %s947_s9, %s950_s11, %s847_s5, %s848_s6, %s849_s8  }
  0x29   : > { %p1079_p0 = scmp.ge.s32.totalorder %s844_s20, 1 }
  0x2b   : > { %p214_p4 = pnand %p1079_p0, %p213_p12 }
  0x2c   : > { %s219_s12 = sand.u32 (!%p214_p4), 1, %s828_s16  }
  0x2d   : > { %217 = sbr.rel (%p214_p4) target bundleno = 921 (0x399), region = 32  ;;  %s621_s13 = sshll.u32 (!%p214_p4), %s219_s12, 6 }
  0x2e   : > { %s220_s14 = scalar_lea.sflag (!%p214_p4), [#allocation6], %s219_s12  ;;  %s982_s15 = scalar_lea.vmem (!%p214_p4), [#allocation5], %s621_s13 }
  0x34   : > { %815 = dma.done.wait (%p926_p7), %s220_s14, 1024  }
  0x35   : > { %817 = vsyncadd (%p926_p7), %s220_s14, 4294966272  ;;  %s622_s23 = sshll.u32 %s836_s18, 1  ;;  %p623_p9 = scmp.ne.s32.totalorder %s836_s18, 0 }
  0x36   : > { %p261_p10 = scmp.lt.s32.totalorder %s622_s23, 7  ;;  %vm274_vm0 = vcmask (!%p623_p9), 7168   ;;  %v850_v0 = vmov (!%p623_p9), -inf   ;;  %v851_v1 = vmov (!%p623_p9), 0.0   ;;  %v852_v2 = vmov (!%p623_p9), 0  }
  0x37   : > { %273 = sbr.rel (%p623_p9) target bundleno = 62 (0x3e), region = 40  ;;  %275 = vst.msk [vmem:[#allocation2] sm:$0xff] (!%p623_p9), %vm274_vm0, %v850_v0  ;;  %276 = vst.msk [vmem:[#allocation3] sm:$0xff] (!%p623_p9), %vm274_vm0, %v851_v1 }
  0x38   : > { %s1089_s23 = smov (!%p261_p10, %s622_s23), 7  ;;  %277 = vst.msk [vmem:[#allocation4] sm:$0xff] (!%p623_p9), %vm274_vm0, %v852_v2 }
  0x39   : > { %s263_s10 = scalar_lea.vmem %s1073_s2, %s1089_s23 }
  0x3e PF: > { %v713_v3 = vld [vmem:[%s982_s15 + $0x4] ss:$8 sps:$4 sm:$0xff]   ;;  %v715_v4 = vld [vmem:[%s982_s15] ss:$8 sps:$4 sm:$0xff]   ;;  %v853_v5 = vmov 0   ;;  %vm339_vm1 = vcmask 523264   ;;  %v289_v13 = vlaneseq }
  0x3f   : > { %375 = vmatprep.mubr.bf16.mxu0 %v853_v5  ;;  %712 = vset.pattern.permute.xlu0 %v853_v5  ;;  %v716_v6 = vld [vmem:[%s982_s15 + $0x14] ss:$8 sps:$4 sm:$0xff]   ;;  %v718_v7 = vld [vmem:[%s982_s15 + $0x10] ss:$8 sps:$4 sm:$0xff]   ;;  %v719_v8 = vld [vmem:[%s982_s15 + $0x24] ss:$8 sps:$4 sm:$0xff]  }
  0x40   : > { %343 = vmatprep.subr.bf16.mxu0 %v713_v3  ;;  %v721_v9 = vld [vmem:[%s982_s15 + $0x20] ss:$8 sps:$4 sm:$0xff]   ;;  %v722_v10 = vld [vmem:[%s982_s15 + $0x34] ss:$8 sps:$4 sm:$0xff]   ;;  %v724_v11 = vld [vmem:[%s982_s15 + $0x30] ss:$8 sps:$4 sm:$0xff]  }
  0x41   : > { %344 = vmatpush1.bf16.msra.mxu0 %v715_v4  ;;  %v278_v12 = vld [vmem:[%s1071_s0] sm:$0xf]  ;;  %v290_v14 = vshrl.u32 %v289_v13, 7  ;;  %s633_s24 = sshll.u32 %s836_s18, 8  ;;  %v395_v27 = vand.u32 127, %v289_v13  ;;  %vm441_vm2 = vcmask 7168  }
  0x42   : > { %345 = vmatprep.subr.bf16.mxu0 %v716_v6  ;;  %v287_v16 = vld [vmem:[%s263_s10] sm:$0x3]  ;;  %s385_s29 = sshra.s32 %s633_s24, 7  ;;  %v421_v54 = vld [vmem:[#allocation3] sm:$0xff]  ;;  %v417_v57 = vstv %s633_s24  ;;  %v444_v60 = vld [vmem:[#allocation4] sm:$0xff]  ;;  %p635_p7 = scmp.ne.s32.totalorder %s836_s18, 3 }
  0x43   : > { %v291_v15 = vsub.s32 0, %v290_v14  ;;  %v295_v17 = vsub.s32 1, %v290_v14  ;;  %s634_s30 = sshll.u32 %s385_s29, 3  ;;  %v419_v28 = vld [vmem:[#allocation2] sm:$0xff]  ;;  %v396_v29 = vadd.s32 128, %v395_v27  ;;  %v854_v2 = vmov (!%p635_p7), 0  }
  0x44   : > { %s388_s5 = scalar_lea.vmem [#allocation8], %s634_s30 }
  0x45   : > { %346 = vmatpush1.bf16.msra.mxu0 %v718_v7  ;;  %v292_v18 = vrot.slane %v287_v16, %v291_v15  ;;  %v296_v19 = vrot.slane %v287_v16, %v295_v17 }
  0x46   : > { %347 = vmatprep.subr.bf16.mxu0 %v719_v8 }
  0x49   : > { %348 = vmatpush1.bf16.msra.mxu0 %v721_v9 }
  0x4a   : > { %349 = vmatprep.subr.bf16.mxu0 %v722_v10 }
  0x4d   : > { %350 = vmatpush1.bf16.msra.mxu0 %v724_v11 }
  0x50   : > { %632 = vmatmul.mubr.msk.bf16.vlgmr.msra.gmra.mrb[0].mxu0 %vm339_vm1, %v278_v12 }
 0x123   : > { %v377_v20 = vpop.f32.mrb[0].mxu0 }
 0x124   : > { %v378_v21 = vadd.f32 %v377_v20, %v292_v18  ;;  %v379_v22 = vpop.f32.mrb[1].mxu0 }
 0x125   : > { %v380_v23 = vadd.f32 %v379_v22, %v296_v19  ;;  %v381_v24 = vpop.f32.mrb[2].mxu0 }
 0x126   : > { %v382_v25 = vpop.f32.mrb[3].mxu0  ;;  %389 = vst [vmem:[%s388_s5] sm:$0xff] %v378_v21 }
 0x127   : > { %v391_v26 = vmax.f32 %v378_v21, %v380_v23  ;;  %390 = vst [vmem:[%s388_s5 + $0x8] sm:$0xff] %v380_v23 }
 0x129   : > { %392 = vmax.xlane.f32.xlu0 %v391_v26 }
 0x12e   : > { %v457_v8 = vld [vmem:[#allocation8] sm:$0xff] (!%p635_p7)  ;;  %v458_v9 = vld [vmem:[#allocation8 + $0x8] sm:$0xff] (!%p635_p7)  ;;  %v459_v10 = vld [vmem:[#allocation8 + $0x10] sm:$0xff] (!%p635_p7) }
 0x12f   : > { %v460_v11 = vld [vmem:[#allocation8 + $0x18] sm:$0xff] (!%p635_p7)  ;;  %v461_v12 = vld [vmem:[#allocation8 + $0x20] sm:$0xff] (!%p635_p7)  ;;  %v462_v13 = vld [vmem:[#allocation8 + $0x28] sm:$0xff] (!%p635_p7) }
 0x130   : > { %v463_v14 = vld [vmem:[#allocation8 + $0x30] sm:$0xff] (!%p635_p7)  ;;  %v464_v15 = vld [vmem:[#allocation8 + $0x38] sm:$0xff] (!%p635_p7) }
 0x1b6   : > { %v393_v30 = vpop.xlane.xlu0 %392 }
 0x1b7   : > { %vm397_vm3 = vcmp.eq.f32.partialorder %v378_v21, %v393_v30  ;;  %vm398_vm4 = vcmp.eq.f32.partialorder %v380_v23, %v393_v30  ;;  %v420_v31 = vmax.f32 %v419_v28, %v393_v30  ;;  %vm443_vm7 = vcmp.gt.f32.partialorder %v393_v30, %v419_v28 }
 0x1b8   : > { %v399_v32 = vsel %vm397_vm3, %v395_v27, 256  ;;  %v400_v33 = vsel %vm398_vm4, %v396_v29, 256 }
 0x1b9   : > { %428 = vperm.xlu0 %712, %v420_v31   ;;  %v422_v34 = vsub.f32 %v419_v28, %v420_v31  ;;  %vm401_vm5 = vcmp.lt.s32.totalorder %v399_v32, %v400_v33  ;;  %447 = vst.msk [vmem:[#allocation2] sm:$0xff] %vm441_vm2, %v420_v31 }
 0x1ba   : > { %v402_v35 = vsel %vm401_vm5, %v399_v32, %v400_v33 }
 0x1bb   : > { %v404_v36 = vshra.s32 %v402_v35, 16  ;;  %v403_v43 = vand.u32 65535, %v402_v35  ;;  %v423_v50 = vmul.f32 1.442695, %v422_v34 }
 0x1bd   : > { %v406_v37 = vcvt.s32.f32 %v404_v36  ;;  %v405_v45 = vcvt.s32.f32 %v403_v43  ;;  %731 = vset.pattern.permute.xlu0 (!%p635_p7), %v854_v2 }
 0x1bf   : > { %407 = vmin.xlane.f32.xlu1 %v406_v37 }
 0x1c0   : > { %v452_v4 = vld [vmem:[#allocation2] sm:$0xff] (!%p635_p7) }
 0x238   : > { %v429_v38 = vpop.permute.xlu0 %428 }
 0x239   : > { %v431_v39 = vsub.f32 %v378_v21, %v429_v38  ;;  %v432_v40 = vsub.f32 %v380_v23, %v429_v38 }
 0x23b   : > { %v433_v41 = vmul.f32 1.442695, %v431_v39  ;;  %v435_v42 = vmul.f32 1.442695, %v432_v40 }
 0x23d   : > { %725 = vpow2.f32 %v433_v41 }
 0x23e   : > { %727 = vpow2.f32 %v435_v42 }
 0x23f   : > { %729 = vpow2.f32 %v423_v50 }
 0x247   : > { %v726_v46 = vpop.eup %725 }
 0x248   : > { %v728_v47 = vpop.eup %727 }
 0x249   : > { %v437_v49 = vadd.f32 %v728_v47, %v726_v46  ;;  %v730_v52 = vpop.eup %729 }
 0x24a   : > { %v425_v59 = vmul.f32 %v730_v52, %v421_v54 }
 0x24c   : > { %v408_v44 = vpop.xlane.xlu1 %407 }
 0x24d   : > { %vm409_vm6 = vcmp.eq.f32.partialorder %v406_v37, %v408_v44  ;;  %v414_v51 = vcvt.f32.s32 %v408_v44 }
 0x24e   : > { %v410_v48 = vsel %vm409_vm6, %v405_v45, inf }
 0x24f   : > { %411 = vmin.xlane.f32.xlu1 %v410_v48  ;;  %v415_v55 = vshll.u32 %v414_v51, 16 }
 0x253   : > { %438 = vadd.xlane.f32.xlu1 %v437_v49 }
 0x2dc   : > { %v412_v53 = vpop.xlane.xlu1 %411 }
 0x2dd   : > { %v413_v56 = vcvt.f32.s32 %v412_v53 }
 0x2de   : > { %451 = sbr.rel (%p635_p7) target bundleno = 896 (0x380), region = 44 }
 0x2df   : > { %v416_v58 = vadd.s32 %v415_v55, %v413_v56 }
 0x2e0   : > { %v439_v61 = vpop.xlane.xlu1 %438 }
 0x2e1   : > { %v418_v62 = vadd.s32 %v417_v57, %v416_v58  ;;  %v440_v63 = vadd.f32 %v439_v61, %v425_v59 }
 0x2e3   : > { %v445_v0 = vsel %vm443_vm7, %v418_v62, %v444_v60  ;;  %442 = vst.msk [vmem:[#allocation3] sm:$0xff] %vm441_vm2, %v440_v63 }
 0x2e4   : > { %446 = vst.msk [vmem:[#allocation4] sm:$0xff] %vm441_vm2, %v445_v0 }
 0x2ea   : > { %v453_v1 = vld [vmem:[#allocation3] sm:$0xff] }
 0x2eb   : > { %732 = vlog2.f32 %v453_v1  ;;  %v486_v7 = vld [vmem:[#allocation4] sm:$0xff] }
 0x2ec   : > { %487 = vst.msk [vmem:[%s1075_s4] sm:$0xff] %vm441_vm2, %v486_v7 }
 0x2f5   : > { %v733_v3 = vpop.eup %732 }
 0x2f6   : > { %v455_v5 = vmul.f32 0.6931472, %v733_v3 }
 0x2f8   : > { %v456_v6 = vadd.f32 %v455_v5, %v452_v4 }
 0x2fa   : > { %467 = vperm.xlu0 %731, %v456_v6  }
 0x379   : > { %v468_v16 = vpop.permute.xlu0 %467 }
 0x37a   : > { %v470_v17 = vsub.f32 %v457_v8, %v468_v16  ;;  %v471_v18 = vsub.f32 %v458_v9, %v468_v16  ;;  %v472_v19 = vsub.f32 %v459_v10, %v468_v16  ;;  %v473_v20 = vsub.f32 %v460_v11, %v468_v16 }
 0x37b   : > { %v474_v21 = vsub.f32 %v461_v12, %v468_v16  ;;  %v475_v22 = vsub.f32 %v462_v13, %v468_v16  ;;  %v476_v23 = vsub.f32 %v463_v14, %v468_v16  ;;  %v477_v24 = vsub.f32 %v464_v15, %v468_v16 }
 0x37c   : > { %478 = vst [vmem:[#allocation8] sm:$0xff] %v470_v17  ;;  %479 = vst [vmem:[#allocation8 + $0x8] sm:$0xff] %v471_v18 }
 0x37d   : > { %480 = vst [vmem:[#allocation8 + $0x10] sm:$0xff] %v472_v19  ;;  %481 = vst [vmem:[#allocation8 + $0x18] sm:$0xff] %v473_v20 }
 0x37e   : > { %482 = vst [vmem:[#allocation8 + $0x20] sm:$0xff] %v474_v21  ;;  %483 = vst [vmem:[#allocation8 + $0x28] sm:$0xff] %v475_v22 }
 0x37f   : > { %484 = vst [vmem:[#allocation8 + $0x30] sm:$0xff] %v476_v23  ;;  %485 = vst [vmem:[#allocation8 + $0x38] sm:$0xff] %v477_v24 }
 0x380 PF: > { %p1027_p5 = scmp.eq.s32.totalorder %s613_s21, 3  ;;  %s855_s12 = smov [#allocation8]  }
 0x381   : > { %s502_s13 = sshll.u32 %s855_s12, 4  ;;  %s503_s13 = int_to_ptr.vmem [resolvable:$true] %s502_s13 }
 0x382   : > { %s764_s14 = scalar_lea.vmem %s503_s13, 1024  ;;  %p771_p13 = scmp.lt.s32.totalorder %s503_s13, %s503_s13 }
 0x383   : > { %p765_p6 = scmp.ne.s32.totalorder %s503_s13, %s764_s14  ;;  %p772_p1 = scmp.lt.s32.totalorder %s764_s14, %s764_s14 }
 0x385   : > { %p766_p8 = pnand %p765_p6, %p1027_p5  ;;  %p773_p2 = por %p772_p1, %p771_p13 }
 0x387   : > { %p767_p11 = pneg %p766_p8 }
 0x389   : > { %p774_p3 = pnand %p773_p2, %p767_p11 }
 0x38b   : > { %777 = shalt.err (!%p774_p3)
}
 0x38c   : > { %s778_s21 = scalar_lea.hbm %s1074_s3, 1024 }
 0x38d   : > { %p779_p12 = scmp.ne.s32.totalorder %s1074_s3, %s778_s21  ;;  %p784_p10 = scmp.lt.u32.totalorder %s778_s21, %s1074_s3 }
 0x38f   : > { %p780_p0 = pnand %p779_p12, %p1027_p5 }
 0x391   : > { %p781_p4 = pneg %p780_p0 }
 0x393   : > { %p786_p9 = pnand %p784_p10, %p781_p4 }
 0x395   : > { %789 = shalt.err (!%p786_p9)
}
 0x396   : > { %645 = dma.vmem_to_hbm [thread:$0]  (%p1027_p5), %s503_s13, 1024, %s1074_s3, [#allocation7]  }
 0x397   : > { %819 = dma.done.wait (%p1027_p5), [#allocation7], 1024  }
 0x398   : > { %821 = vsyncadd (%p1027_p5), [#allocation7], 4294966272 }
 0x399 PF: > { %s19_s20 = sadd.s32 1, %s844_s20   ;;  %s1081_s15 = smov %s828_s16 }
 0x39a   : > { %p16_p7 = scmp.ge.s32.totalorder %s19_s20, 6   ;;  %s1082_s16 = smov %s832_s17 }
 0x39b   : > { %s1083_s17 = smov %s932_s27  ;;  %s1084_s18 = smov %s840_s19 }
 0x39c   : > { %s1085_s19 = smov %s1087_s22  ;;  %18 = sbr.rel (!%p16_p7) target bundleno = 5 (0x5), region = 97 }
 0x3a3   :  { %525 = vsyncpa [#allocation6], 1 }
 0x3a4   :  { %527 = vsyncpa [#allocation6 + $0x1], 1 }
 0x3a5   :  { %528 = vsyncpa [#allocation7], 1 }
 0x3a6   :  { %530 = vsyncpa [#allocation7 + $0x1], 1 }

</bundles_post_ra>
